<compile_context>
chip_gen: v5e
topology: v5e:2x2
jax: 0.10.0
libtpu: 0.0.40
codegen_flags: <defaults>
</compile_context>

<pallas_src>
import jax
import jax.numpy as jnp
from jax.experimental import pallas as pl
from jax.experimental.pallas import tpu as pltpu


def _round_up(x, m):
    return ((x + m - 1) // m) * m


def _encoder_kernel(x_ref, w1_ref, b1_ref, w2_ref, b2_ref, w3_ref, b3_ref, out_ref):
    """Fused 3-layer MLP encoder tile.

    f32 x is read straight from HBM and cast to bf16 in-register for the MXU;
    accumulation, bias adds and activations stay in f32 (v5e has no bf16 VPU/EUP).
    """
    x = x_ref[...].astype(jnp.bfloat16)

    # Layer 1: Linear + LeakyReLU(0.2)
    h1 = jnp.dot(x, w1_ref[...], preferred_element_type=jnp.float32) + b1_ref[...]
    h1 = jnp.where(h1 >= 0.0, h1, 0.2 * h1)

    # Dropout(p=0.2) is identity in eval mode (model.eval() + torch.no_grad()).

    # Layer 2: Linear + Tanh
    h2 = jnp.dot(h1.astype(jnp.bfloat16), w2_ref[...],
                 preferred_element_type=jnp.float32) + b2_ref[...]
    h2 = jnp.tanh(h2)

    # Layer 3: Linear (latent projection, lane-padded to a multiple of 128)
    out = jnp.dot(h2.astype(jnp.bfloat16), w3_ref[...],
                  preferred_element_type=jnp.float32) + b3_ref[...]
    out_ref[...] = out.astype(out_ref.dtype)


def prepare_params(params):
    """One-time parameter prep (hoisted out of the per-call hot path).

    Zero-pads every layer's output width to a multiple of 128 lanes and casts
    weights to bf16 for the MXU. Padding is exact: b* padded entries are zero,
    LeakyReLU(0)=0 and tanh(0)=0, and the corresponding padded weight ROWS of
    the next layer are zero, so padded lanes contribute nothing. Biases stay
    f32 (added in f32 in-kernel).
    """
    w1, b1, w2, b2, w3, b3 = params
    h1_pad = _round_up(w1.shape[1], 128)
    h2_pad = _round_up(w2.shape[1], 128)
    out_pad = _round_up(w3.shape[1], 128)

    w1 = jnp.pad(w1, ((0, 0), (0, h1_pad - w1.shape[1])))
    b1 = jnp.pad(b1, ((0, 0), (0, h1_pad - b1.shape[1])))
    w2 = jnp.pad(w2, ((0, h1_pad - w2.shape[0]), (0, h2_pad - w2.shape[1])))
    b2 = jnp.pad(b2, ((0, 0), (0, h2_pad - b2.shape[1])))
    w3 = jnp.pad(w3, ((0, h2_pad - w3.shape[0]), (0, out_pad - w3.shape[1])))
    b3 = jnp.pad(b3, ((0, 0), (0, out_pad - b3.shape[1])))

    return (w1.astype(jnp.bfloat16), b1.astype(jnp.float32),
            w2.astype(jnp.bfloat16), b2.astype(jnp.float32),
            w3.astype(jnp.bfloat16), b3.astype(jnp.float32))


def _choose_row_tile(n_pad):
    """Row tile: multiple of 16 (bf16 output sublane packing) and of 256 (MXU M)
    when large; sized so the grid has >=2 steps when there's enough work so that
    v7x's two TensorCores both get rows under the 'parallel' semantics."""
    TM_MAX = 2048                       # multiple of 256; f32 x tile = 1 MiB
    if n_pad <= 512:
        return n_pad                    # small problems: one shot, no split
    return min(TM_MAX, _round_up(pl.cdiv(n_pad, 2), 256))


def encoder_forward(x_flat, prepped_params, latent_dim):
    """x_flat: (N, input_dim) float32. Returns (N, latent_dim) float32."""
    w1, b1, w2, b2, w3, b3 = prepped_params
    n, input_dim = x_flat.shape
    h1_pad, h2_pad, out_pad = w1.shape[1], w2.shape[1], w3.shape[1]

    # Pad rows only to the 16-row sublane granule (NOT the tile size); partial
    # edge tiles are handled by Pallas block masking, so no dead full-tile work.
    n_pad = _round_up(n, 16)
    if n_pad != n:
        x_flat = jnp.pad(x_flat, ((0, n_pad - n), (0, 0)))

    tm = _choose_row_tile(n_pad)
    grid = (pl.cdiv(n_pad, tm),)

    # TODO(synk): if profiling at large N shows exposed input DMA, add
    # pipeline_mode=pl.Buffered(3) to the x spec only (weights stay default).
    row_in_spec = pl.BlockSpec((tm, input_dim), lambda i: (i, 0))
    row_out_spec = pl.BlockSpec((tm, out_pad), lambda i: (i, 0))
    resident = lambda shape: pl.BlockSpec(shape, lambda i: (0, 0))  # VMEM-resident

    cost = pl.CostEstimate(
        flops=2 * n_pad * (input_dim * h1_pad + h1_pad * h2_pad + h2_pad * out_pad),
        transcendentals=n_pad * h2_pad,
        bytes_accessed=(n_pad * input_dim * 4                     # f32 x read
                        + (w1.size + w2.size + w3.size) * 2       # bf16 weights
                        + (b1.size + b2.size + b3.size) * 4       # f32 biases
                        + n_pad * out_pad * 2),                   # bf16 output
    )

    out = pl.pallas_call(
        _encoder_kernel,
        out_shape=jax.ShapeDtypeStruct((n_pad, out_pad), jnp.bfloat16),
        grid=grid,
        in_specs=[
            row_in_spec,
            resident(w1.shape), resident(b1.shape),
            resident(w2.shape), resident(b2.shape),
            resident(w3.shape), resident(b3.shape),
        ],
        out_specs=row_out_spec,
        compiler_params=pltpu.CompilerParams(
            dimension_semantics=("parallel",),      # megacore row sharding on v7x
        ),
        cost_estimate=cost,
    )(x_flat, w1, b1, w2, b2, w3, b3)

    # Strip row/lane padding, then upcast the much smaller sliced result to f32.
    return out[:n, :latent_dim].astype(jnp.float32)


def dimensionality_reducer_forward(x, prepped_params, latent_dim):
    """Mirrors DimensionalityReducer.forward for method='autoencoder' (eval mode)."""
    batch, seq_len, feat_dim = x.shape
    x_flat = x.reshape(-1, feat_dim)
    reduced = encoder_forward(x_flat, prepped_params, latent_dim)
    return reduced.reshape(batch, seq_len, latent_dim)


def init_params(key, input_dim, latent_dim):
    """Deterministic PyTorch-style Linear init: U(-1/sqrt(fan_in), 1/sqrt(fan_in)).
    Weights stored transposed as (in, out); biases as (1, out)."""
    dims = [
        (input_dim, latent_dim * 4),
        (latent_dim * 4, latent_dim * 2),
        (latent_dim * 2, latent_dim),
    ]
    params = []
    for fan_in, fan_out in dims:
        key, kw, kb = jax.random.split(key, 3)
        bound = 1.0 / (fan_in ** 0.5)
        w = jax.random.uniform(kw, (fan_in, fan_out), jnp.float32, -bound, bound)
        b = jax.random.uniform(kb, (1, fan_out), jnp.float32, -bound, bound)
        params += [w, b]
    return tuple(params)


if __name__ == "__main__":
    input_dim = 128
    latent_dim = 32
    batch, seq_len = 2, 8

    key = jax.random.PRNGKey(0)
    key_x, key_p = jax.random.split(key)
    x = jax.random.normal(key_x, (batch, seq_len, input_dim), jnp.float32)
    raw_params = init_params(key_p, input_dim, latent_dim)

    # One-time parameter prep (padding + bf16 cast) hoisted out of the hot path.
    prepped = prepare_params(raw_params)

    out = dimensionality_reducer_forward(x, prepped, latent_dim)
    out = jax.block_until_ready(out)

    # Pure-JAX f32 reference of the encoder (bf16 MXU + bf16 store => looser tol).
    w1, b1, w2, b2, w3, b3 = raw_params
    xf = x.reshape(-1, input_dim)
    h1 = xf @ w1 + b1
    h1 = jnp.where(h1 >= 0, h1, 0.2 * h1)
    h2 = jnp.tanh(h1 @ w2 + b2)
    ref = (h2 @ w3 + b3).reshape(batch, seq_len, latent_dim)

    assert out.shape == (batch, seq_len, latent_dim)
    max_err = float(jnp.max(jnp.abs(out - ref)))
    assert max_err < 5e-2, max_err

    print("KERNEL_OK")
</pallas_src>

<mosaic_0001>
module attributes {stable_mosaic.version = 11 : i64} {
  func.func @_encoder_kernel(%arg0: i32, %arg1: memref<16x128xf32, #tpu.memory_space<vmem>>, %arg2: memref<128x128xbf16, #tpu.memory_space<vmem>>, %arg3: memref<1x128xf32, #tpu.memory_space<vmem>>, %arg4: memref<128x128xbf16, #tpu.memory_space<vmem>>, %arg5: memref<1x128xf32, #tpu.memory_space<vmem>>, %arg6: memref<128x128xbf16, #tpu.memory_space<vmem>>, %arg7: memref<1x128xf32, #tpu.memory_space<vmem>>, %arg8: memref<16x128xbf16, #tpu.memory_space<vmem>>) attributes {dimension_semantics = [#tpu.dimension_semantics<parallel>], iteration_bounds = array<i64: 1>, scalar_prefetch = 0 : i64, scratch_operands = 0 : i64, tpu.core_type = #tpu.core_type<tc>, window_params = [{transform_indices = @transform_0, window_bounds = array<i64: 16, 128>}, {pipeline_mode = #tpu.pipeline_mode<synchronous>, transform_indices = @transform_1, window_bounds = array<i64: 128, 128>}, {pipeline_mode = #tpu.pipeline_mode<synchronous>, transform_indices = @transform_2, window_bounds = array<i64: 1, 128>}, {pipeline_mode = #tpu.pipeline_mode<synchronous>, transform_indices = @transform_3, window_bounds = array<i64: 128, 128>}, {pipeline_mode = #tpu.pipeline_mode<synchronous>, transform_indices = @transform_4, window_bounds = array<i64: 1, 128>}, {pipeline_mode = #tpu.pipeline_mode<synchronous>, transform_indices = @transform_5, window_bounds = array<i64: 128, 128>}, {pipeline_mode = #tpu.pipeline_mode<synchronous>, transform_indices = @transform_6, window_bounds = array<i64: 1, 128>}, {transform_indices = @transform_7, window_bounds = array<i64: 16, 128>}]} {
    %c0 = arith.constant 0 : index
    %c0_0 = arith.constant 0 : index
    %0 = vector.load %arg1[%c0, %c0_0] : memref<16x128xf32, #tpu.memory_space<vmem>>, vector<16x128xf32>
    %1 = arith.truncf %0 : vector<16x128xf32> to vector<16x128xbf16>
    %c0_1 = arith.constant 0 : index
    %c0_2 = arith.constant 0 : index
    %2 = vector.load %arg2[%c0_1, %c0_2] : memref<128x128xbf16, #tpu.memory_space<vmem>>, vector<128x128xbf16>
    %cst = arith.constant dense<0.000000e+00> : vector<16x128xf32>
    %3 = tpu.matmul %1, %2, %cst {dimension_numbers = #tpu.dot_dimension_numbers<[1], [0], [0], [1], [0, 0, 1, 1], [], []>} : vector<16x128xbf16>, vector<128x128xbf16>, vector<16x128xf32> -> vector<16x128xf32>
    %c0_3 = arith.constant 0 : index
    %c0_4 = arith.constant 0 : index
    %4 = vector.load %arg3[%c0_3, %c0_4] : memref<1x128xf32, #tpu.memory_space<vmem>>, vector<1x128xf32>
    %5 = vector.broadcast %4 : vector<1x128xf32> to vector<16x128xf32>
    %6 = arith.addf %3, %5 : vector<16x128xf32>
    %cst_5 = arith.constant 0.000000e+00 : f32
    %7 = vector.broadcast %cst_5 : f32 to vector<16x128xf32>
    %8 = arith.cmpf oge, %6, %7 : vector<16x128xf32>
    %cst_6 = arith.constant 2.000000e-01 : f32
    %9 = vector.broadcast %cst_6 : f32 to vector<16x128xf32>
    %10 = arith.mulf %9, %6 : vector<16x128xf32>
    %11 = arith.select %8, %6, %10 : vector<16x128xi1>, vector<16x128xf32>
    %12 = arith.truncf %11 : vector<16x128xf32> to vector<16x128xbf16>
    %c0_7 = arith.constant 0 : index
    %c0_8 = arith.constant 0 : index
    %13 = vector.load %arg4[%c0_7, %c0_8] : memref<128x128xbf16, #tpu.memory_space<vmem>>, vector<128x128xbf16>
    %cst_9 = arith.constant dense<0.000000e+00> : vector<16x128xf32>
    %14 = tpu.matmul %12, %13, %cst_9 {dimension_numbers = #tpu.dot_dimension_numbers<[1], [0], [0], [1], [0, 0, 1, 1], [], []>} : vector<16x128xbf16>, vector<128x128xbf16>, vector<16x128xf32> -> vector<16x128xf32>
    %c0_10 = arith.constant 0 : index
    %c0_11 = arith.constant 0 : index
    %15 = vector.load %arg5[%c0_10, %c0_11] : memref<1x128xf32, #tpu.memory_space<vmem>>, vector<1x128xf32>
    %16 = vector.broadcast %15 : vector<1x128xf32> to vector<16x128xf32>
    %17 = arith.addf %14, %16 : vector<16x128xf32>
    %18 = math.tanh %17 : vector<16x128xf32>
    %19 = arith.truncf %18 : vector<16x128xf32> to vector<16x128xbf16>
    %c0_12 = arith.constant 0 : index
    %c0_13 = arith.constant 0 : index
    %20 = vector.load %arg6[%c0_12, %c0_13] : memref<128x128xbf16, #tpu.memory_space<vmem>>, vector<128x128xbf16>
    %cst_14 = arith.constant dense<0.000000e+00> : vector<16x128xf32>
    %21 = tpu.matmul %19, %20, %cst_14 {dimension_numbers = #tpu.dot_dimension_numbers<[1], [0], [0], [1], [0, 0, 1, 1], [], []>} : vector<16x128xbf16>, vector<128x128xbf16>, vector<16x128xf32> -> vector<16x128xf32>
    %c0_15 = arith.constant 0 : index
    %c0_16 = arith.constant 0 : index
    %22 = vector.load %arg7[%c0_15, %c0_16] : memref<1x128xf32, #tpu.memory_space<vmem>>, vector<1x128xf32>
    %23 = vector.broadcast %22 : vector<1x128xf32> to vector<16x128xf32>
    %24 = arith.addf %21, %23 : vector<16x128xf32>
    %25 = arith.truncf %24 : vector<16x128xf32> to vector<16x128xbf16>
    %c0_17 = arith.constant 0 : index
    %c0_18 = arith.constant 0 : index
    %26 = vector.load %arg8[%c0_17, %c0_18] : memref<16x128xbf16, #tpu.memory_space<vmem>>, vector<16x128xbf16>
    tpu.vector_store %arg8[%c0_17, %c0_18], %25 {strides = array<i32>} : memref<16x128xbf16, #tpu.memory_space<vmem>>, vector<16x128xbf16>,
    return
  }
  func.func @transform_0(%arg0: i32) -> (i32, i32) {
    %c0_i32 = arith.constant 0 : i32
    %c0_i32_0 = arith.constant 0 : i32
    return %arg0, %c0_i32 : i32, i32
  }
  func.func @transform_1(%arg0: i32) -> (i32, i32) {
    %c0_i32 = arith.constant 0 : i32
    %c0_i32_0 = arith.constant 0 : i32
    %c0_i32_1 = arith.constant 0 : i32
    return %c0_i32, %c0_i32_0 : i32, i32
  }
  func.func @transform_2(%arg0: i32) -> (i32, i32) {
    %c0_i32 = arith.constant 0 : i32
    %c0_i32_0 = arith.constant 0 : i32
    %c0_i32_1 = arith.constant 0 : i32
    return %c0_i32, %c0_i32_0 : i32, i32
  }
  func.func @transform_3(%arg0: i32) -> (i32, i32) {
    %c0_i32 = arith.constant 0 : i32
    %c0_i32_0 = arith.constant 0 : i32
    %c0_i32_1 = arith.constant 0 : i32
    return %c0_i32, %c0_i32_0 : i32, i32
  }
  func.func @transform_4(%arg0: i32) -> (i32, i32) {
    %c0_i32 = arith.constant 0 : i32
    %c0_i32_0 = arith.constant 0 : i32
    %c0_i32_1 = arith.constant 0 : i32
    return %c0_i32, %c0_i32_0 : i32, i32
  }
  func.func @transform_5(%arg0: i32) -> (i32, i32) {
    %c0_i32 = arith.constant 0 : i32
    %c0_i32_0 = arith.constant 0 : i32
    %c0_i32_1 = arith.constant 0 : i32
    return %c0_i32, %c0_i32_0 : i32, i32
  }
  func.func @transform_6(%arg0: i32) -> (i32, i32) {
    %c0_i32 = arith.constant 0 : i32
    %c0_i32_0 = arith.constant 0 : i32
    %c0_i32_1 = arith.constant 0 : i32
    return %c0_i32, %c0_i32_0 : i32, i32
  }
  func.func @transform_7(%arg0: i32) -> (i32, i32) {
    %c0_i32 = arith.constant 0 : i32
    %c0_i32_0 = arith.constant 0 : i32
    return %arg0, %c0_i32 : i32, i32
  }
}

</mosaic_0001>

<bundles_post_ra>
// kernel: tpu_custom_call.1
= control target key start
LH: loop header
LB: loop body
LE: loop exit
PB: predicated region body
PF: predicated region fallthrough
CT: control target
= control target key end

     0   :  { %12 = vsyncpa [#allocation3], 0  ;;  %s728_s0 = inlined_call_operand.hbm [shape: f32[16,128], index: 0, kind: input, shape index: {}]   ;;  %s729_s1 = inlined_call_operand.hbm [shape: bf16[128,128], index: 1, kind: input, shape index: {}]   ;;  %s730_s2 = inlined_call_operand.vmem [shape: f32[1,128], index: 2, kind: input, shape index: {}]   ;;  %s731_s3 = inlined_call_operand.hbm [shape: bf16[128,128], index: 3, kind: input, shape index: {}]   ;;  %s732_s4 = inlined_call_operand.vmem [shape: f32[1,128], index: 4, kind: input, shape index: {}]   ;;  %s733_s5 = inlined_call_operand.hbm [shape: bf16[128,128], index: 5, kind: input, shape index: {}]   ;;  %s734_s6 = inlined_call_operand.vmem [shape: f32[1,128], index: 6, kind: input, shape index: {}]   ;;  %s735_s7 = inlined_call_operand.hbm [shape: bf16[16,128], index: 7, kind: output, shape index: {}]  }
   0x1   :  { %13 = vsyncpa [#allocation6], 0 }
   0x2   :  { %14 = vsyncpa [#allocation9], 0  ;;  %s33_s26 = sshll.u32 %s729_s1, 4  ;;  %s34_s26 = int_to_ptr.hbm [resolvable:$true] %s33_s26 }
   0x3   :  { %15 = vsyncpa [#allocation4], 0  ;;  %s643_s27 = smov [#allocation5]   ;;  %s20_s8 = sshll.u32 %s728_s0, 4  ;;  %s21_s8 = int_to_ptr.hbm [resolvable:$true] %s20_s8 }
   0x4   :  { %s35_s28 = sshll.u32 %s643_s27, 4  ;;  %s644_s9 = smov 64   ;;  %s36_s28 = int_to_ptr.vmem [resolvable:$true] %s35_s28 }
   0x5   :  { %s645_s10 = smov 4   ;;  %s646_s11 = smov [#allocation2]  }
   0x6   :  { %41 = dma.hbm_to_vmem [thread:$0]  %s34_s26, 1024, %s36_s28, [#allocation6], %s644_s9, %s644_s9, %s645_s10  }
   0x7   :  { %s22_s12 = sshll.u32 %s646_s11, 4  ;;  %s647_s1 = smov 128   ;;  %s23_s12 = int_to_ptr.vmem [resolvable:$true] %s22_s12 }
   0x8   :  { %s648_s13 = smov 8   ;;  %s48_s16 = sshll.u32 %s731_s3, 4  ;;  %s49_s16 = int_to_ptr.hbm [resolvable:$true] %s48_s16 }
   0x9   :  { %28 = dma.hbm_to_vmem [thread:$0]  %s21_s8, 256, %s23_s12, [#allocation3], %s647_s1, %s647_s1, %s648_s13  }
   0xa   :  { %s649_s17 = smov [#allocation7]   ;;  %s63_s20 = sshll.u32 %s733_s5, 4  ;;  %s64_s20 = int_to_ptr.hbm [resolvable:$true] %s63_s20 }
   0xb   :  { %s50_s0 = sshll.u32 %s649_s17, 4  ;;  %s650_s21 = smov [#allocation8]   ;;  %s51_s0 = int_to_ptr.vmem [resolvable:$true] %s50_s0 }
   0xc   :  { %56 = dma.hbm_to_vmem [thread:$0]  %s49_s16, 1024, %s51_s0, [#allocation6], %s644_s9, %s644_s9, %s645_s10  }
   0xd   :  { %s65_s22 = sshll.u32 %s650_s21, 4  ;;  %s66_s22 = int_to_ptr.vmem [resolvable:$true] %s65_s22 }
   0xe   :  { %71 = dma.hbm_to_vmem [thread:$0]  %s64_s20, 1024, %s66_s22, [#allocation9], %s644_s9, %s644_s9, %s645_s10  }
   0xf   :  { %635 = dma.done.wait [#allocation3], 256  }
  0x10   :  { %636 = vsyncadd [#allocation3], 4294967040 }
  0x11   :  { %637 = dma.done.wait [#allocation6], 2048  }
  0x12   :  { %638 = vsyncadd [#allocation6], 4294965248 }
  0x13   :  { %639 = dma.done.wait [#allocation9], 1024  }
  0x14   :  { %640 = vsyncadd [#allocation9], 4294966272  ;;  %v477_v0 = vld [vmem:[#allocation5 + $0x38] sm:$0xff]  ;;  %v476_v1 = vld [vmem:[#allocation5 + $0x30] sm:$0xff]  ;;  %s651_s26 = smov [#allocation10]  }
  0x15   :  { %161 = vmatpush.bf16.msra.mxu0 %v477_v0  ;;  %v485_v2 = vld [vmem:[#allocation7 + $0x38] sm:$0xff]  ;;  %v484_v3 = vld [vmem:[#allocation7 + $0x30] sm:$0xff]  ;;  %v475_v4 = vld [vmem:[#allocation5 + $0x28] sm:$0xff]  ;;  %s357_s27 = sshll.u32 %s651_s26, 4  ;;  %s358_s27 = int_to_ptr.vmem [resolvable:$true] %s357_s27 }
  0x16   :  { %250 = vmatpush.bf16.msra.mxu1 %v485_v2  ;;  %v483_v5 = vld [vmem:[#allocation7 + $0x28] sm:$0xff]  ;;  %v474_v6 = vld [vmem:[#allocation5 + $0x20] sm:$0xff]  ;;  %v473_v8 = vld [vmem:[#allocation5 + $0x18] sm:$0xff] }
  0x17   :  { %v482_v7 = vld [vmem:[#allocation7 + $0x20] sm:$0xff]  ;;  %v472_v9 = vld [vmem:[#allocation5 + $0x10] sm:$0xff]  ;;  %v471_v10 = vld [vmem:[#allocation5 + $0x8] sm:$0xff] }
  0x18   :  { %v470_v11 = vld [vmem:[#allocation5] sm:$0xff]  ;;  %v90_v12 = vld [vmem:[#allocation2] sm:$0xff]  ;;  %v91_v13 = vld [vmem:[#allocation2 + $0x8] sm:$0xff] }
  0x19   :  { %162 = vmatpush.bf16.msra.mxu0 %v476_v1  ;;  %v92_v14 = vpack.c.bf16 %v91_v13, %v90_v12  ;;  %v481_v15 = vld [vmem:[#allocation7 + $0x18] sm:$0xff]  ;;  %v480_v16 = vld [vmem:[#allocation7 + $0x10] sm:$0xff]  ;;  %v479_v17 = vld [vmem:[#allocation7 + $0x8] sm:$0xff] }
  0x1a   :  { %251 = vmatpush.bf16.msra.mxu1 %v484_v3  ;;  %v478_v18 = vld [vmem:[#allocation7] sm:$0xff]  ;;  %v493_v19 = vld [vmem:[#allocation8 + $0x38] sm:$0xff]  ;;  %v492_v20 = vld [vmem:[#allocation8 + $0x30] sm:$0xff] }
  0x1b   :  { %335 = vmatpush.bf16.msra.mxu2 %v493_v19  ;;  %v491_v21 = vld [vmem:[#allocation8 + $0x28] sm:$0xff]  ;;  %v508_v23 = vld [vmem:[%s730_s2] ss:$0 sm:$0xff]  ;;  %v490_v32 = vld [vmem:[#allocation8 + $0x20] sm:$0xff] }
  0x1c   :  { %v489_v33 = vld [vmem:[#allocation8 + $0x18] sm:$0xff]  ;;  %v488_v34 = vld [vmem:[#allocation8 + $0x10] sm:$0xff]  ;;  %v487_v35 = vld [vmem:[#allocation8 + $0x8] sm:$0xff] }
  0x1d   :  { %163 = vmatpush.bf16.msra.mxu0 %v475_v4  ;;  %v486_v36 = vld [vmem:[#allocation8] sm:$0xff]  ;;  %v509_v38 = vld [vmem:[%s732_s4] ss:$0 sm:$0xff]  ;;  %s359_s4 = sshll.u32 %s735_s7, 4  ;;  %s360_s4 = int_to_ptr.hbm [resolvable:$true] %s359_s4 }
  0x1e   :  { %252 = vmatpush.bf16.msra.mxu1 %v483_v5  ;;  %v510_v46 = vld [vmem:[%s734_s6] ss:$0 sm:$0xff] }
  0x1f   :  { %336 = vmatpush.bf16.msra.mxu2 %v492_v20 }
  0x21   :  { %164 = vmatpush.bf16.msra.mxu0 %v474_v6 }
  0x22   :  { %253 = vmatpush.bf16.msra.mxu1 %v482_v7 }
  0x23   :  { %337 = vmatpush.bf16.msra.mxu2 %v491_v21 }
  0x25   :  { %165 = vmatpush.bf16.msra.mxu0 %v473_v8 }
  0x26   :  { %254 = vmatpush.bf16.msra.mxu1 %v481_v15 }
  0x27   :  { %338 = vmatpush.bf16.msra.mxu2 %v490_v32 }
  0x29   :  { %166 = vmatpush.bf16.msra.mxu0 %v472_v9 }
  0x2a   :  { %255 = vmatpush.bf16.msra.mxu1 %v480_v16 }
  0x2b   :  { %339 = vmatpush.bf16.msra.mxu2 %v489_v33 }
  0x2d   :  { %167 = vmatpush.bf16.msra.mxu0 %v471_v10 }
  0x2e   :  { %256 = vmatpush.bf16.msra.mxu1 %v479_v17 }
  0x2f   :  { %340 = vmatpush.bf16.msra.mxu2 %v488_v34 }
  0x31   :  { %168 = vmatpush.bf16.msra.mxu0 %v470_v11 }
  0x32   :  { %257 = vmatpush.bf16.msra.mxu1 %v478_v18 }
  0x33   :  { %341 = vmatpush.bf16.msra.mxu2 %v487_v35 }
  0x34   :  { %169 = vmatmul.bf16.vlgmr.msra.gmra.mxu0 %v92_v14 }
  0x37   :  { %342 = vmatpush.bf16.msra.mxu2 %v486_v36 }
  0xb1   :  { %v170_v22 = vpop.f32.mrf.mxu0 }
  0xb2   :  { %v171_v24 = vadd.f32 %v508_v23, %v170_v22 }
  0xb4   :  { %v177_v26 = vmul.f32 0.2, %v171_v24  ;;  %vm175_vm0 = vcmp.ge.f32.partialorder %v171_v24, 0.0 }
  0xb6   :  { %v179_v29 = vsel %vm175_vm0, %v171_v24, %v177_v26 }
  0xb9   :  { %v172_v25 = vpop.f32.mrf.mxu0 }
  0xba   :  { %v173_v27 = vadd.f32 %v508_v23, %v172_v25 }
  0xbc   :  { %v178_v28 = vmul.f32 0.2, %v173_v27  ;;  %vm176_vm1 = vcmp.ge.f32.partialorder %v173_v27, 0.0 }
  0xbe   :  { %v180_v30 = vsel %vm176_vm1, %v173_v27, %v178_v28 }
  0xbf   :  { %v181_v31 = vpack.c.bf16 %v180_v30, %v179_v29 }
  0xc1   :  { %258 = vmatmul.bf16.vlgmr.msra.gmra.mxu1 %v181_v31 }
 0x13e   :  { %v259_v37 = vpop.f32.mrf.mxu1 }
 0x13f   :  { %v260_v39 = vadd.f32 %v509_v38, %v259_v37 }
 0x141   :  { %511 = vtanh.f32 %v260_v39 }
 0x146   :  { %v261_v40 = vpop.f32.mrf.mxu1 }
 0x147   :  { %v262_v41 = vadd.f32 %v509_v38, %v261_v40  ;;  %v512_v42 = vpop.eup %511 }
 0x149   :  { %513 = vtanh.f32 %v262_v41 }
 0x14f   :  { %v514_v43 = vpop.eup %513 }
 0x150   :  { %v266_v44 = vpack.c.bf16 %v514_v43, %v512_v42 }
 0x152   :  { %343 = vmatmul.bf16.vlgmr.msra.gmra.mxu2 %v266_v44 }
 0x1d5   :  { %v344_v45 = vpop.f32.mrf.mxu2 }
 0x1d6   :  { %v345_v48 = vadd.f32 %v510_v46, %v344_v45 }
 0x1dd   :  { %v346_v47 = vpop.f32.mrf.mxu2 }
 0x1de   :  { %v347_v49 = vadd.f32 %v510_v46, %v346_v47 }
 0x1e0   :  { %v497_v50 = vpack.c.bf16 %v347_v49, %v345_v48 }
 0x1e2   :  { %498 = vst [vmem:[#allocation10] sm:$0xff] %v497_v50  }
 0x1e3   :  { %365 = dma.vmem_to_hbm [thread:$0]  %s358_s27, 128, %s360_s4, [#allocation4], %s644_s9, %s644_s9, %s645_s10  }
 0x1e4   :  { %641 = dma.done.wait [#allocation4], 128  }
 0x1e5   :  { %642 = vsyncadd [#allocation4], 4294967168 }
 0x1e6   :  { %370 = vsyncpa [#allocation3], 1 }
 0x1e7   :  { %371 = vsyncpa [#allocation6], 1 }
 0x1e8   :  { %372 = vsyncpa [#allocation9], 1 }
 0x1e9   :  { %373 = vsyncpa [#allocation4], 1 }

</bundles_post_ra>
